<compile_context>
chip_gen: v5e
topology: v5e:2x2
jax: 0.10.0
libtpu: 0.0.40
codegen_flags: <defaults>
</compile_context>

<pallas_src>
import jax
import jax.numpy as jnp
from jax.experimental import pallas as pl
from jax.experimental.pallas import tpu as pltpu

EPS = 1e-5

_VMEM_BUDGET_BYTES = 24 * 1024 * 1024   # target total pipelined working set
_VMEM_LIMIT_BYTES = 48 * 1024 * 1024    # < v7x 64 MiB physical; > v5e 16 MiB default


def frozen_bn_kernel(x_ref, scale_ref, shift_ref, o_ref):
    # x_ref:               (block_rows, H*W)  activation tile
    # scale_ref/shift_ref: (block_rows, 1)    folded per-row statistics (f32)
    x = x_ref[...].astype(jnp.float32)
    o_ref[...] = (x * scale_ref[...] + shift_ref[...]).astype(o_ref.dtype)


def _pick_block_rows(rows, cols, itemsize):
    # Sublane packing: 8 rows/vreg for f32, 16 for bf16, 32 for int8/fp8.
    row_align = max(8, 32 // int(itemsize))
    # Double-buffered VMEM bytes per slab row held at once:
    #   x tile + out tile (activation dtype) + scale + shift, where each
    #   (block_rows, 1) f32 param pads its lane dim to 128 inside VMEM.
    per_row = 2 * (2 * cols * int(itemsize) + 2 * 128 * 4)
    block_rows = max(row_align,
                     (_VMEM_BUDGET_BYTES // per_row) // row_align * row_align)
    if rows >= 2 * row_align:
        # Keep at least 2 grid steps so the "parallel" axis can be sharded
        # across both TensorCores on v7x (no-op on v5e/v6e).
        half = -(-((rows + 1) // 2) // row_align) * row_align
        block_rows = min(block_rows, half)
    return min(block_rows, rows)


def frozen_batch_norm_2d(x, weight, bias, running_mean, running_var, eps=EPS):
    """x: (N, C, H, W). weight/bias/running_mean/running_var: (C,)."""
    N, C, H, W = x.shape
    rows, cols = N * C, H * W

    # Fold the frozen statistics into scale/shift on the tiny (C,) vectors.
    w = weight.astype(jnp.float32)
    b = bias.astype(jnp.float32)
    rm = running_mean.astype(jnp.float32)
    rv = running_var.astype(jnp.float32)
    scale_c = w * jax.lax.rsqrt(rv + eps)
    shift_c = b - rm * scale_c

    # One scalar per (n, c) row of the (N*C, H*W) slab (row index = n*C + c).
    scale_rows = jnp.tile(scale_c, (N,)).reshape(rows, 1)
    shift_rows = jnp.tile(shift_c, (N,)).reshape(rows, 1)

    x2d = x.reshape(rows, cols)

    itemsize = jnp.dtype(x.dtype).itemsize
    block_rows = _pick_block_rows(rows, cols, itemsize)
    grid = (pl.cdiv(rows, block_rows),)

    slab_spec = pl.BlockSpec((block_rows, cols), lambda i: (i, 0))
    param_spec = pl.BlockSpec((block_rows, 1), lambda i: (i, 0))

    out2d = pl.pallas_call(
        frozen_bn_kernel,
        out_shape=jax.ShapeDtypeStruct((rows, cols), x.dtype),
        grid_spec=pl.GridSpec(
            grid=grid,
            in_specs=[slab_spec, param_spec, param_spec],
            out_specs=slab_spec,
        ),
        compiler_params=pltpu.CompilerParams(
            dimension_semantics=("parallel",),
            vmem_limit_bytes=_VMEM_LIMIT_BYTES,
        ),
    )(x2d, scale_rows, shift_rows)

    return out2d.reshape(N, C, H, W)


if __name__ == "__main__":
    key = jax.random.PRNGKey(0)
    kx, kw, kb, km, kv = jax.random.split(key, 5)

    N, C, H, W = 2, 4, 16, 16
    x = jax.random.normal(kx, (N, C, H, W), dtype=jnp.float32)

    # Deterministic "frozen" buffers (module __init__ shapes: all (C,)).
    weight = 1.0 + 0.1 * jax.random.normal(kw, (C,), dtype=jnp.float32)
    bias = 0.1 * jax.random.normal(kb, (C,), dtype=jnp.float32)
    running_mean = 0.05 * jax.random.normal(km, (C,), dtype=jnp.float32)
    running_var = 1.0 + 0.1 * jax.random.uniform(kv, (C,), dtype=jnp.float32)

    out = frozen_batch_norm_2d(x, weight, bias, running_mean, running_var)
    out = jax.block_until_ready(out)

    # Pure-JAX reference (mirrors the PyTorch forward exactly).
    w_ = weight.reshape(1, C, 1, 1)
    b_ = bias.reshape(1, C, 1, 1)
    rv_ = running_var.reshape(1, C, 1, 1)
    rm_ = running_mean.reshape(1, C, 1, 1)
    scale = w_ * jax.lax.rsqrt(rv_ + EPS)
    ref = x * scale + (b_ - rm_ * scale)

    assert out.shape == (N, C, H, W)
    assert jnp.allclose(out, ref, atol=1e-5, rtol=1e-5)
    print("KERNEL_OK")
</pallas_src>

<mosaic_0001>
module attributes {stable_mosaic.version = 11 : i64} {
  func.func @frozen_bn_kernel(%arg0: i32, %arg1: memref<8x256xf32, #tpu.memory_space<vmem>>, %arg2: memref<8x1xf32, #tpu.memory_space<vmem>>, %arg3: memref<8x1xf32, #tpu.memory_space<vmem>>, %arg4: memref<8x256xf32, #tpu.memory_space<vmem>>) attributes {dimension_semantics = [#tpu.dimension_semantics<parallel>], iteration_bounds = array<i64: 1>, scalar_prefetch = 0 : i64, scratch_operands = 0 : i64, tpu.core_type = #tpu.core_type<tc>, window_params = [{transform_indices = @transform_0, window_bounds = array<i64: 8, 256>}, {transform_indices = @transform_1, window_bounds = array<i64: 8, 1>}, {transform_indices = @transform_2, window_bounds = array<i64: 8, 1>}, {transform_indices = @transform_3, window_bounds = array<i64: 8, 256>}]} {
    %c0 = arith.constant 0 : index
    %c0_0 = arith.constant 0 : index
    %0 = vector.load %arg1[%c0, %c0_0] : memref<8x256xf32, #tpu.memory_space<vmem>>, vector<8x256xf32>
    %c0_1 = arith.constant 0 : index
    %c0_2 = arith.constant 0 : index
    %1 = vector.load %arg2[%c0_1, %c0_2] : memref<8x1xf32, #tpu.memory_space<vmem>>, vector<8x1xf32>
    %2 = vector.broadcast %1 : vector<8x1xf32> to vector<8x256xf32>
    %3 = arith.mulf %0, %2 : vector<8x256xf32>
    %c0_3 = arith.constant 0 : index
    %c0_4 = arith.constant 0 : index
    %4 = vector.load %arg3[%c0_3, %c0_4] : memref<8x1xf32, #tpu.memory_space<vmem>>, vector<8x1xf32>
    %5 = vector.broadcast %4 : vector<8x1xf32> to vector<8x256xf32>
    %6 = arith.addf %3, %5 : vector<8x256xf32>
    %c0_5 = arith.constant 0 : index
    %c0_6 = arith.constant 0 : index
    %7 = vector.load %arg4[%c0_5, %c0_6] : memref<8x256xf32, #tpu.memory_space<vmem>>, vector<8x256xf32>
    tpu.vector_store %arg4[%c0_5, %c0_6], %6 {strides = array<i32>} : memref<8x256xf32, #tpu.memory_space<vmem>>, vector<8x256xf32>,
    return
  }
  func.func @transform_0(%arg0: i32) -> (i32, i32) {
    %c0_i32 = arith.constant 0 : i32
    %c0_i32_0 = arith.constant 0 : i32
    return %arg0, %c0_i32 : i32, i32
  }
  func.func @transform_1(%arg0: i32) -> (i32, i32) {
    %c0_i32 = arith.constant 0 : i32
    %c0_i32_0 = arith.constant 0 : i32
    return %arg0, %c0_i32 : i32, i32
  }
  func.func @transform_2(%arg0: i32) -> (i32, i32) {
    %c0_i32 = arith.constant 0 : i32
    %c0_i32_0 = arith.constant 0 : i32
    return %arg0, %c0_i32 : i32, i32
  }
  func.func @transform_3(%arg0: i32) -> (i32, i32) {
    %c0_i32 = arith.constant 0 : i32
    %c0_i32_0 = arith.constant 0 : i32
    return %arg0, %c0_i32 : i32, i32
  }
}

</mosaic_0001>

<bundles_post_ra>
// kernel: tpu_custom_call.1
= control target key start
LH: loop header
LB: loop body
LE: loop exit
PB: predicated region body
PF: predicated region fallthrough
CT: control target
= control target key end

     0   :  { %s117_s0 = inlined_call_operand.vmem [shape: f32[8,256], index: 0, kind: input, shape index: {}]   ;;  %s118_s1 = inlined_call_operand.vmem [shape: f32[8,1], index: 1, kind: input, shape index: {}]   ;;  %s119_s2 = inlined_call_operand.vmem [shape: f32[8,1], index: 2, kind: input, shape index: {}]   ;;  %s120_s3 = inlined_call_operand.hbm [shape: f32[8,256], index: 3, kind: output, shape index: {}]  }
   0x1   :  { %v17_v0 = vld [vmem:[%s118_s1] sm:$0xff] }
   0x2   :  { %8 = vsyncpa [#allocation3], 0  ;;  %v80_v1 = vmov 0   ;;  %v25_v2 = vld [vmem:[%s119_s2] sm:$0xff]  ;;  %v16_v5 = vld [vmem:[%s117_s0 + $0x8] sm:$0xff]  ;;  %s81_s1 = smov [#allocation2]  }
   0x3   :  { %53 = vset.pattern.permute.xlu0 %v80_v1  ;;  %v15_v4 = vld [vmem:[%s117_s0] sm:$0xff]  ;;  %s40_s20 = sshll.u32 %s81_s1, 4  ;;  %s42_s23 = sshll.u32 %s120_s3, 4  ;;  %s41_s20 = int_to_ptr.vmem [resolvable:$true] %s40_s20  ;;  %s43_s23 = int_to_ptr.hbm [resolvable:$true] %s42_s23 }
   0x4   :  { %20 = vperm.xlu0 %53, %v17_v0  }
   0xc   :  { %28 = vperm.xlu0 %53, %v25_v2  }
  0x76   :  { %v21_v3 = vpop.permute.xlu0 %20 }
  0x77   :  { %v23_v6 = vmul.f32 %v21_v3, %v15_v4  ;;  %v24_v7 = vmul.f32 %v21_v3, %v16_v5 }
  0x7e   :  { %v29_v8 = vpop.permute.xlu0 %28 }
  0x7f   :  { %v31_v9 = vadd.f32 %v29_v8, %v23_v6  ;;  %v32_v10 = vadd.f32 %v29_v8, %v24_v7 }
  0x81   :  { %33 = vst [vmem:[#allocation2] sm:$0xff] %v31_v9 }
  0x82   :  { %34 = vst [vmem:[#allocation2 + $0x8] sm:$0xff] %v32_v10 }
  0x83   :  { %45 = dma.vmem_to_hbm [thread:$0]  %s41_s20, 256, %s43_s23, [#allocation3]  }
  0x84   :  { %78 = dma.done.wait [#allocation3], 256  }
  0x85   :  { %79 = vsyncadd [#allocation3], 4294967040 }
  0x86   :  { %50 = vsyncpa [#allocation3], 1 }

</bundles_post_ra>
